<compile_context>
chip_gen: v6e
topology: v6e:2x2x1
jax: 0.10.0
libtpu: 0.0.40
codegen_flags: <defaults>
</compile_context>

<pallas_src>
import numpy as np
import jax
import jax.numpy as jnp
from jax import lax
from jax.experimental import pallas as pl
from jax.experimental.pallas import tpu as pltpu


def _mlif_kernel(params_ref, x_ref, out_ref, v_ref, dv_ref):
    """Runs bT time steps of the recurrence for one (bN, bT, bd) tile.

    params_ref : SMEM (4,) f32 = [1/tau, th, momentum, lamb]
    x_ref      : VMEM (bN, bT, bd), caller dtype (f32 or bf16)
    out_ref    : VMEM (bN, bT, bd), caller dtype (spikes, 0/1)
    v_ref      : VMEM (bN, bd) f32 — post-reset membrane, carried across T axis
    dv_ref     : VMEM (bN, bd) f32 — momentum term, carried across T axis
    """
    inv_tau = params_ref[0]
    th = params_ref[1]
    momentum = params_ref[2]
    lamb = params_ref[3]

    # T is the innermost ("arbitrary") grid axis: reset carried state at t_block 0.
    @pl.when(pl.program_id(2) == 0)
    def _():
        v_ref[...] = jnp.zeros_like(v_ref)
        dv_ref[...] = jnp.zeros_like(dv_ref)

    v = v_ref[...]
    dv = dv_ref[...]
    bT = x_ref.shape[1]
    for t in range(bT):                        # bounded static unroll (bT <= 16)
        xt = x_ref[:, t, :].astype(jnp.float32)      # per-step upcast, in-register
        dv = momentum * dv + (xt - v) * inv_tau
        u = v + dv
        spike = u >= th
        out_ref[:, t, :] = spike.astype(out_ref.dtype)
        v = jnp.where(spike, lamb, u)                # hard reset to lamb on spike
    v_ref[...] = v
    dv_ref[...] = dv


def _pick_block_d(D, cap=1024):
    """Largest multiple of 128 that divides D (<= cap), else the full D extent."""
    if D % 128 == 0:
        for k in range(cap // 128, 0, -1):
            if D % (128 * k) == 0:
                return 128 * k
    return D  # full-extent last dim (allowed by the (8,128) rule)


def _pick_block_t(T):
    if T <= 16:
        return T          # full extent — typical SNN time windows are small
    for c in (16, 8):
        if T % c == 0:
            return c
    # TODO(synk): very long T not divisible by 8 falls back to a full-extent
    # (fully unrolled) T block; fine for typical SNN T, suboptimal for huge T.
    return T


def _pick_block_n(N, bT, bd, itemsize):
    # Keep the per-step working set (bN*bd f32 state) vreg-friendly (<= 8 vregs
    # per carried array) and the whole tile <= ~4 MiB so 2x-in + 2x-out double
    # buffers always stay well inside the scoped-VMEM limit.
    cap = max(1, 8192 // bd)
    cap = min(cap, max(1, (4 * 1024 * 1024) // max(1, bT * bd * itemsize)))
    cap = min(cap, N)
    for b in range(cap, 0, -1):
        if N % b == 0:
            return b
    return 1


def momentum_lif_pallas(x_ntd, params):
    """x_ntd: [N, T, D] (float dtype). params: (4,) f32 = [1/tau, th, momentum, lamb].

    Returns the spike train, same shape and dtype as x_ntd.
    """
    N, T, D = x_ntd.shape
    itemsize = jnp.dtype(x_ntd.dtype).itemsize
    bd = _pick_block_d(D)
    bT = _pick_block_t(T)
    bN = _pick_block_n(N, bT, bd, itemsize)
    grid = (N // bN, D // bd, T // bT)

    return pl.pallas_call(
        _mlif_kernel,
        out_shape=jax.ShapeDtypeStruct((N, T, D), x_ntd.dtype),
        grid_spec=pltpu.PrefetchScalarGridSpec(
            num_scalar_prefetch=0,
            grid=grid,
            in_specs=[
                # runtime scalars live in SMEM (no per-value recompile)
                pl.BlockSpec(memory_space=pltpu.MemorySpace.SMEM),
                pl.BlockSpec((bN, bT, bd), lambda i, j, t: (i, t, j)),
            ],
            out_specs=pl.BlockSpec((bN, bT, bd), lambda i, j, t: (i, t, j)),
            scratch_shapes=[pltpu.VMEM((bN, bd), jnp.float32),   # v  (post-reset u)
                            pltpu.VMEM((bN, bd), jnp.float32)],  # dv (momentum term)
        ),
        compiler_params=pltpu.CompilerParams(
            dimension_semantics=("parallel", "parallel", "arbitrary"),
            vmem_limit_bytes=32 * 1024 * 1024),
    )(params, x_ntd)


class MomentumLIF:
    """JAX/Pallas port of the MomentumLIF module (forward pass only)."""

    def __init__(self, tau=2.0, th=1.0, momentum=0.0, lamb=0.0,
                 learnable_mt=False, learnable_lb=False, regular=False,
                 suro=4, alpha=lambda: 1.0):
        # Parameters are single-element tensors in the PyTorch module.
        self.tau = jnp.array([tau], dtype=jnp.float32)
        self.th = jnp.array([th], dtype=jnp.float32)
        self.momentum = jnp.array([momentum], dtype=jnp.float32)
        self.lamb = jnp.array([lamb], dtype=jnp.float32)
        self.regular = regular
        # suro / alpha only parameterize the surrogate gradient (backward pass).
        self.suro, self.alpha = suro, alpha

    def __call__(self, x):
        # x: [N, T, *feature_dims] — same convention as the CUDA launch.
        lamb = jax.nn.sigmoid(self.lamb) if self.regular else self.lamb
        N, T = x.shape[0], x.shape[1]
        D = int(np.prod(x.shape[2:])) if x.ndim > 2 else 1
        # Runtime SMEM scalars; reciprocal of tau is computed once on the host side.
        params = jnp.concatenate(
            [1.0 / self.tau, self.th, self.momentum, lamb]).astype(jnp.float32)
        # No transpose, no pad, no dtype cast of x: reshape is a free collapse of
        # the trailing feature dims.
        out = momentum_lif_pallas(x.reshape(N, T, D), params)
        return out.reshape(x.shape)


def _reference_forward(x, inv_tau, th, momentum, lamb):
    """Pure-JAX reference (lax.scan over time) using the same arithmetic."""
    N, T = x.shape[0], x.shape[1]
    D = int(np.prod(x.shape[2:])) if x.ndim > 2 else 1
    x_tnd = jnp.moveaxis(x.reshape(N, T, D).astype(jnp.float32), 1, 0)

    def step(carry, xt):
        v, dv = carry
        dv = momentum * dv + (xt - v) * inv_tau
        u = v + dv
        s = u >= th
        v = jnp.where(s, lamb, u)
        return (v, dv), s.astype(x.dtype)

    z = jnp.zeros((N, D), jnp.float32)
    _, spikes = lax.scan(step, (z, z), x_tnd)
    return jnp.moveaxis(spikes, 0, 1).reshape(x.shape)


if __name__ == "__main__":
    # Small deterministic example: batch N=2, time T=8, features C=4, H=W=16.
    key = jax.random.PRNGKey(0)
    N, T, C, H, W = 2, 8, 4, 16, 16
    x = jax.random.normal(key, (N, T, C, H, W), dtype=jnp.float32)

    # Non-default momentum / lamb to exercise the full recurrence.
    neuron = MomentumLIF(tau=2.0, th=1.0, momentum=0.25, lamb=0.1)

    spikes = jax.block_until_ready(neuron(x))

    ref = _reference_forward(
        x,
        inv_tau=jnp.float32(1.0) / jnp.float32(2.0),
        th=jnp.float32(1.0),
        momentum=jnp.float32(0.25),
        lamb=jnp.float32(0.1),
    )
    np.testing.assert_allclose(np.asarray(spikes), np.asarray(ref),
                               rtol=0.0, atol=0.0)
    assert spikes.shape == x.shape and spikes.dtype == x.dtype

    print("KERNEL_OK")
</pallas_src>

<mosaic_0001>
module attributes {stable_mosaic.version = 11 : i64} {
  func.func @_mlif_kernel(%arg0: i32, %arg1: i32, %arg2: i32, %arg3: memref<4xf32, #tpu.memory_space<smem>>, %arg4: memref<2x8x1024xf32, #tpu.memory_space<vmem>>, %arg5: memref<2x8x1024xf32, #tpu.memory_space<vmem>>, %arg6: memref<2x1024xf32, #tpu.memory_space<vmem>>, %arg7: memref<2x1024xf32, #tpu.memory_space<vmem>>) attributes {dimension_semantics = [#tpu.dimension_semantics<parallel>, #tpu.dimension_semantics<parallel>, #tpu.dimension_semantics<arbitrary>], iteration_bounds = array<i64: 1, 1, 1>, scalar_prefetch = 0 : i64, scratch_operands = 2 : i64, tpu.core_type = #tpu.core_type<tc>, window_params = [{transform_indices = @transform_0, window_bounds = array<i64: 4>}, {transform_indices = @transform_1, window_bounds = array<i64: 2, 8, 1024>}, {transform_indices = @transform_2, window_bounds = array<i64: 2, 8, 1024>}]} {
    %c0 = arith.constant 0 : index
    %0 = memref.load %arg3[%c0] : memref<4xf32, #tpu.memory_space<smem>>
    %c1 = arith.constant 1 : index
    %1 = memref.load %arg3[%c1] : memref<4xf32, #tpu.memory_space<smem>>
    %c2 = arith.constant 2 : index
    %2 = memref.load %arg3[%c2] : memref<4xf32, #tpu.memory_space<smem>>
    %c3 = arith.constant 3 : index
    %3 = memref.load %arg3[%c3] : memref<4xf32, #tpu.memory_space<smem>>
    %c0_i32 = arith.constant 0 : i32
    %4 = arith.cmpi eq, %arg2, %c0_i32 : i32
    %5 = arith.extui %4 : i1 to i32
    %c0_i32_0 = arith.constant 0 : i32
    %6 = arith.cmpi ne, %5, %c0_i32_0 : i32
    scf.if %6 {
      %cst = arith.constant 0.000000e+00 : f32
      %155 = vector.broadcast %cst : f32 to vector<2x1024xf32>
      %c0_53 = arith.constant 0 : index
      %c0_54 = arith.constant 0 : index
      %156 = vector.load %arg6[%c0_53, %c0_54] : memref<2x1024xf32, #tpu.memory_space<vmem>>, vector<2x1024xf32>
      tpu.vector_store %arg6[%c0_53, %c0_54], %155 {strides = array<i32>} : memref<2x1024xf32, #tpu.memory_space<vmem>>, vector<2x1024xf32>,
      %cst_55 = arith.constant 0.000000e+00 : f32
      %157 = vector.broadcast %cst_55 : f32 to vector<2x1024xf32>
      %c0_56 = arith.constant 0 : index
      %c0_57 = arith.constant 0 : index
      %158 = vector.load %arg7[%c0_56, %c0_57] : memref<2x1024xf32, #tpu.memory_space<vmem>>, vector<2x1024xf32>
      tpu.vector_store %arg7[%c0_56, %c0_57], %157 {strides = array<i32>} : memref<2x1024xf32, #tpu.memory_space<vmem>>, vector<2x1024xf32>,
    } else {
    }
    %c0_1 = arith.constant 0 : index
    %c0_2 = arith.constant 0 : index
    %7 = vector.load %arg6[%c0_1, %c0_2] : memref<2x1024xf32, #tpu.memory_space<vmem>>, vector<2x1024xf32>
    %c0_3 = arith.constant 0 : index
    %c0_4 = arith.constant 0 : index
    %8 = vector.load %arg7[%c0_3, %c0_4] : memref<2x1024xf32, #tpu.memory_space<vmem>>, vector<2x1024xf32>
    %c0_5 = arith.constant 0 : index
    %c0_6 = arith.constant 0 : index
    %c0_7 = arith.constant 0 : index
    %9 = vector.load %arg4[%c0_5, %c0_6, %c0_7] : memref<2x8x1024xf32, #tpu.memory_space<vmem>>, vector<2x1x1024xf32>
    %10 = vector.shape_cast %9 : vector<2x1x1024xf32> to vector<2x1024xf32>
    %11 = vector.broadcast %2 : f32 to vector<2x1024xf32>
    %12 = arith.mulf %11, %8 : vector<2x1024xf32>
    %13 = arith.subf %10, %7 : vector<2x1024xf32>
    %14 = vector.broadcast %0 : f32 to vector<2x1024xf32>
    %15 = arith.mulf %13, %14 : vector<2x1024xf32>
    %16 = arith.addf %12, %15 : vector<2x1024xf32>
    %17 = arith.addf %7, %16 : vector<2x1024xf32>
    %18 = vector.broadcast %1 : f32 to vector<2x1024xf32>
    %19 = arith.cmpf oge, %17, %18 : vector<2x1024xf32>
    %20 = arith.extui %19 : vector<2x1024xi1> to vector<2x1024xi32>
    %21 = arith.sitofp %20 : vector<2x1024xi32> to vector<2x1024xf32>
    %c0_8 = arith.constant 0 : index
    %c0_9 = arith.constant 0 : index
    %c0_10 = arith.constant 0 : index
    %22 = vector.load %arg5[%c0_8, %c0_9, %c0_10] : memref<2x8x1024xf32, #tpu.memory_space<vmem>>, vector<2x1x1024xf32>
    %23 = vector.shape_cast %22 : vector<2x1x1024xf32> to vector<2x1024xf32>
    %24 = vector.shape_cast %21 : vector<2x1024xf32> to vector<2x1x1024xf32>
    tpu.vector_store %arg5[%c0_8, %c0_9, %c0_10], %24 {strides = array<i32>} : memref<2x8x1024xf32, #tpu.memory_space<vmem>>, vector<2x1x1024xf32>,
    %25 = vector.broadcast %3 : f32 to vector<2x1024xf32>
    %26 = arith.select %19, %25, %17 : vector<2x1024xi1>, vector<2x1024xf32>
    %c0_11 = arith.constant 0 : index
    %c1_12 = arith.constant 1 : index
    %c0_13 = arith.constant 0 : index
    %27 = vector.load %arg4[%c0_11, %c1_12, %c0_13] : memref<2x8x1024xf32, #tpu.memory_space<vmem>>, vector<2x1x1024xf32>
    %28 = vector.shape_cast %27 : vector<2x1x1024xf32> to vector<2x1024xf32>
    %29 = vector.broadcast %2 : f32 to vector<2x1024xf32>
    %30 = arith.mulf %29, %16 : vector<2x1024xf32>
    %31 = arith.subf %28, %26 : vector<2x1024xf32>
    %32 = vector.broadcast %0 : f32 to vector<2x1024xf32>
    %33 = arith.mulf %31, %32 : vector<2x1024xf32>
    %34 = arith.addf %30, %33 : vector<2x1024xf32>
    %35 = arith.addf %26, %34 : vector<2x1024xf32>
    %36 = vector.broadcast %1 : f32 to vector<2x1024xf32>
    %37 = arith.cmpf oge, %35, %36 : vector<2x1024xf32>
    %38 = arith.extui %37 : vector<2x1024xi1> to vector<2x1024xi32>
    %39 = arith.sitofp %38 : vector<2x1024xi32> to vector<2x1024xf32>
    %c0_14 = arith.constant 0 : index
    %c1_15 = arith.constant 1 : index
    %c0_16 = arith.constant 0 : index
    %40 = vector.load %arg5[%c0_14, %c1_15, %c0_16] : memref<2x8x1024xf32, #tpu.memory_space<vmem>>, vector<2x1x1024xf32>
    %41 = vector.shape_cast %40 : vector<2x1x1024xf32> to vector<2x1024xf32>
    %42 = vector.shape_cast %39 : vector<2x1024xf32> to vector<2x1x1024xf32>
    tpu.vector_store %arg5[%c0_14, %c1_15, %c0_16], %42 {strides = array<i32>} : memref<2x8x1024xf32, #tpu.memory_space<vmem>>, vector<2x1x1024xf32>,
    %43 = vector.broadcast %3 : f32 to vector<2x1024xf32>
    %44 = arith.select %37, %43, %35 : vector<2x1024xi1>, vector<2x1024xf32>
    %c0_17 = arith.constant 0 : index
    %c2_18 = arith.constant 2 : index
    %c0_19 = arith.constant 0 : index
    %45 = vector.load %arg4[%c0_17, %c2_18, %c0_19] : memref<2x8x1024xf32, #tpu.memory_space<vmem>>, vector<2x1x1024xf32>
    %46 = vector.shape_cast %45 : vector<2x1x1024xf32> to vector<2x1024xf32>
    %47 = vector.broadcast %2 : f32 to vector<2x1024xf32>
    %48 = arith.mulf %47, %34 : vector<2x1024xf32>
    %49 = arith.subf %46, %44 : vector<2x1024xf32>
    %50 = vector.broadcast %0 : f32 to vector<2x1024xf32>
    %51 = arith.mulf %49, %50 : vector<2x1024xf32>
    %52 = arith.addf %48, %51 : vector<2x1024xf32>
    %53 = arith.addf %44, %52 : vector<2x1024xf32>
    %54 = vector.broadcast %1 : f32 to vector<2x1024xf32>
    %55 = arith.cmpf oge, %53, %54 : vector<2x1024xf32>
    %56 = arith.extui %55 : vector<2x1024xi1> to vector<2x1024xi32>
    %57 = arith.sitofp %56 : vector<2x1024xi32> to vector<2x1024xf32>
    %c0_20 = arith.constant 0 : index
    %c2_21 = arith.constant 2 : index
    %c0_22 = arith.constant 0 : index
    %58 = vector.load %arg5[%c0_20, %c2_21, %c0_22] : memref<2x8x1024xf32, #tpu.memory_space<vmem>>, vector<2x1x1024xf32>
    %59 = vector.shape_cast %58 : vector<2x1x1024xf32> to vector<2x1024xf32>
    %60 = vector.shape_cast %57 : vector<2x1024xf32> to vector<2x1x1024xf32>
    tpu.vector_store %arg5[%c0_20, %c2_21, %c0_22], %60 {strides = array<i32>} : memref<2x8x1024xf32, #tpu.memory_space<vmem>>, vector<2x1x1024xf32>,
    %61 = vector.broadcast %3 : f32 to vector<2x1024xf32>
    %62 = arith.select %55, %61, %53 : vector<2x1024xi1>, vector<2x1024xf32>
    %c0_23 = arith.constant 0 : index
    %c3_24 = arith.constant 3 : index
    %c0_25 = arith.constant 0 : index
    %63 = vector.load %arg4[%c0_23, %c3_24, %c0_25] : memref<2x8x1024xf32, #tpu.memory_space<vmem>>, vector<2x1x1024xf32>
    %64 = vector.shape_cast %63 : vector<2x1x1024xf32> to vector<2x1024xf32>
    %65 = vector.broadcast %2 : f32 to vector<2x1024xf32>
    %66 = arith.mulf %65, %52 : vector<2x1024xf32>
    %67 = arith.subf %64, %62 : vector<2x1024xf32>
    %68 = vector.broadcast %0 : f32 to vector<2x1024xf32>
    %69 = arith.mulf %67, %68 : vector<2x1024xf32>
    %70 = arith.addf %66, %69 : vector<2x1024xf32>
    %71 = arith.addf %62, %70 : vector<2x1024xf32>
    %72 = vector.broadcast %1 : f32 to vector<2x1024xf32>
    %73 = arith.cmpf oge, %71, %72 : vector<2x1024xf32>
    %74 = arith.extui %73 : vector<2x1024xi1> to vector<2x1024xi32>
    %75 = arith.sitofp %74 : vector<2x1024xi32> to vector<2x1024xf32>
    %c0_26 = arith.constant 0 : index
    %c3_27 = arith.constant 3 : index
    %c0_28 = arith.constant 0 : index
    %76 = vector.load %arg5[%c0_26, %c3_27, %c0_28] : memref<2x8x1024xf32, #tpu.memory_space<vmem>>, vector<2x1x1024xf32>
    %77 = vector.shape_cast %76 : vector<2x1x1024xf32> to vector<2x1024xf32>
    %78 = vector.shape_cast %75 : vector<2x1024xf32> to vector<2x1x1024xf32>
    tpu.vector_store %arg5[%c0_26, %c3_27, %c0_28], %78 {strides = array<i32>} : memref<2x8x1024xf32, #tpu.memory_space<vmem>>, vector<2x1x1024xf32>,
    %79 = vector.broadcast %3 : f32 to vector<2x1024xf32>
    %80 = arith.select %73, %79, %71 : vector<2x1024xi1>, vector<2x1024xf32>
    %c0_29 = arith.constant 0 : index
    %c4 = arith.constant 4 : index
    %c0_30 = arith.constant 0 : index
    %81 = vector.load %arg4[%c0_29, %c4, %c0_30] : memref<2x8x1024xf32, #tpu.memory_space<vmem>>, vector<2x1x1024xf32>
    %82 = vector.shape_cast %81 : vector<2x1x1024xf32> to vector<2x1024xf32>
    %83 = vector.broadcast %2 : f32 to vector<2x1024xf32>
    %84 = arith.mulf %83, %70 : vector<2x1024xf32>
    %85 = arith.subf %82, %80 : vector<2x1024xf32>
    %86 = vector.broadcast %0 : f32 to vector<2x1024xf32>
    %87 = arith.mulf %85, %86 : vector<2x1024xf32>
    %88 = arith.addf %84, %87 : vector<2x1024xf32>
    %89 = arith.addf %80, %88 : vector<2x1024xf32>
    %90 = vector.broadcast %1 : f32 to vector<2x1024xf32>
    %91 = arith.cmpf oge, %89, %90 : vector<2x1024xf32>
    %92 = arith.extui %91 : vector<2x1024xi1> to vector<2x1024xi32>
    %93 = arith.sitofp %92 : vector<2x1024xi32> to vector<2x1024xf32>
    %c0_31 = arith.constant 0 : index
    %c4_32 = arith.constant 4 : index
    %c0_33 = arith.constant 0 : index
    %94 = vector.load %arg5[%c0_31, %c4_32, %c0_33] : memref<2x8x1024xf32, #tpu.memory_space<vmem>>, vector<2x1x1024xf32>
    %95 = vector.shape_cast %94 : vector<2x1x1024xf32> to vector<2x1024xf32>
    %96 = vector.shape_cast %93 : vector<2x1024xf32> to vector<2x1x1024xf32>
    tpu.vector_store %arg5[%c0_31, %c4_32, %c0_33], %96 {strides = array<i32>} : memref<2x8x1024xf32, #tpu.memory_space<vmem>>, vector<2x1x1024xf32>,
    %97 = vector.broadcast %3 : f32 to vector<2x1024xf32>
    %98 = arith.select %91, %97, %89 : vector<2x1024xi1>, vector<2x1024xf32>
    %c0_34 = arith.constant 0 : index
    %c5 = arith.constant 5 : index
    %c0_35 = arith.constant 0 : index
    %99 = vector.load %arg4[%c0_34, %c5, %c0_35] : memref<2x8x1024xf32, #tpu.memory_space<vmem>>, vector<2x1x1024xf32>
    %100 = vector.shape_cast %99 : vector<2x1x1024xf32> to vector<2x1024xf32>
    %101 = vector.broadcast %2 : f32 to vector<2x1024xf32>
    %102 = arith.mulf %101, %88 : vector<2x1024xf32>
    %103 = arith.subf %100, %98 : vector<2x1024xf32>
    %104 = vector.broadcast %0 : f32 to vector<2x1024xf32>
    %105 = arith.mulf %103, %104 : vector<2x1024xf32>
    %106 = arith.addf %102, %105 : vector<2x1024xf32>
    %107 = arith.addf %98, %106 : vector<2x1024xf32>
    %108 = vector.broadcast %1 : f32 to vector<2x1024xf32>
    %109 = arith.cmpf oge, %107, %108 : vector<2x1024xf32>
    %110 = arith.extui %109 : vector<2x1024xi1> to vector<2x1024xi32>
    %111 = arith.sitofp %110 : vector<2x1024xi32> to vector<2x1024xf32>
    %c0_36 = arith.constant 0 : index
    %c5_37 = arith.constant 5 : index
    %c0_38 = arith.constant 0 : index
    %112 = vector.load %arg5[%c0_36, %c5_37, %c0_38] : memref<2x8x1024xf32, #tpu.memory_space<vmem>>, vector<2x1x1024xf32>
    %113 = vector.shape_cast %112 : vector<2x1x1024xf32> to vector<2x1024xf32>
    %114 = vector.shape_cast %111 : vector<2x1024xf32> to vector<2x1x1024xf32>
    tpu.vector_store %arg5[%c0_36, %c5_37, %c0_38], %114 {strides = array<i32>} : memref<2x8x1024xf32, #tpu.memory_space<vmem>>, vector<2x1x1024xf32>,
    %115 = vector.broadcast %3 : f32 to vector<2x1024xf32>
    %116 = arith.select %109, %115, %107 : vector<2x1024xi1>, vector<2x1024xf32>
    %c0_39 = arith.constant 0 : index
    %c6 = arith.constant 6 : index
    %c0_40 = arith.constant 0 : index
    %117 = vector.load %arg4[%c0_39, %c6, %c0_40] : memref<2x8x1024xf32, #tpu.memory_space<vmem>>, vector<2x1x1024xf32>
    %118 = vector.shape_cast %117 : vector<2x1x1024xf32> to vector<2x1024xf32>
    %119 = vector.broadcast %2 : f32 to vector<2x1024xf32>
    %120 = arith.mulf %119, %106 : vector<2x1024xf32>
    %121 = arith.subf %118, %116 : vector<2x1024xf32>
    %122 = vector.broadcast %0 : f32 to vector<2x1024xf32>
    %123 = arith.mulf %121, %122 : vector<2x1024xf32>
    %124 = arith.addf %120, %123 : vector<2x1024xf32>
    %125 = arith.addf %116, %124 : vector<2x1024xf32>
    %126 = vector.broadcast %1 : f32 to vector<2x1024xf32>
    %127 = arith.cmpf oge, %125, %126 : vector<2x1024xf32>
    %128 = arith.extui %127 : vector<2x1024xi1> to vector<2x1024xi32>
    %129 = arith.sitofp %128 : vector<2x1024xi32> to vector<2x1024xf32>
    %c0_41 = arith.constant 0 : index
    %c6_42 = arith.constant 6 : index
    %c0_43 = arith.constant 0 : index
    %130 = vector.load %arg5[%c0_41, %c6_42, %c0_43] : memref<2x8x1024xf32, #tpu.memory_space<vmem>>, vector<2x1x1024xf32>
    %131 = vector.shape_cast %130 : vector<2x1x1024xf32> to vector<2x1024xf32>
    %132 = vector.shape_cast %129 : vector<2x1024xf32> to vector<2x1x1024xf32>
    tpu.vector_store %arg5[%c0_41, %c6_42, %c0_43], %132 {strides = array<i32>} : memref<2x8x1024xf32, #tpu.memory_space<vmem>>, vector<2x1x1024xf32>,
    %133 = vector.broadcast %3 : f32 to vector<2x1024xf32>
    %134 = arith.select %127, %133, %125 : vector<2x1024xi1>, vector<2x1024xf32>
    %c0_44 = arith.constant 0 : index
    %c7 = arith.constant 7 : index
    %c0_45 = arith.constant 0 : index
    %135 = vector.load %arg4[%c0_44, %c7, %c0_45] : memref<2x8x1024xf32, #tpu.memory_space<vmem>>, vector<2x1x1024xf32>
    %136 = vector.shape_cast %135 : vector<2x1x1024xf32> to vector<2x1024xf32>
    %137 = vector.broadcast %2 : f32 to vector<2x1024xf32>
    %138 = arith.mulf %137, %124 : vector<2x1024xf32>
    %139 = arith.subf %136, %134 : vector<2x1024xf32>
    %140 = vector.broadcast %0 : f32 to vector<2x1024xf32>
    %141 = arith.mulf %139, %140 : vector<2x1024xf32>
    %142 = arith.addf %138, %141 : vector<2x1024xf32>
    %143 = arith.addf %134, %142 : vector<2x1024xf32>
    %144 = vector.broadcast %1 : f32 to vector<2x1024xf32>
    %145 = arith.cmpf oge, %143, %144 : vector<2x1024xf32>
    %146 = arith.extui %145 : vector<2x1024xi1> to vector<2x1024xi32>
    %147 = arith.sitofp %146 : vector<2x1024xi32> to vector<2x1024xf32>
    %c0_46 = arith.constant 0 : index
    %c7_47 = arith.constant 7 : index
    %c0_48 = arith.constant 0 : index
    %148 = vector.load %arg5[%c0_46, %c7_47, %c0_48] : memref<2x8x1024xf32, #tpu.memory_space<vmem>>, vector<2x1x1024xf32>
    %149 = vector.shape_cast %148 : vector<2x1x1024xf32> to vector<2x1024xf32>
    %150 = vector.shape_cast %147 : vector<2x1024xf32> to vector<2x1x1024xf32>
    tpu.vector_store %arg5[%c0_46, %c7_47, %c0_48], %150 {strides = array<i32>} : memref<2x8x1024xf32, #tpu.memory_space<vmem>>, vector<2x1x1024xf32>,
    %151 = vector.broadcast %3 : f32 to vector<2x1024xf32>
    %152 = arith.select %145, %151, %143 : vector<2x1024xi1>, vector<2x1024xf32>
    %c0_49 = arith.constant 0 : index
    %c0_50 = arith.constant 0 : index
    %153 = vector.load %arg6[%c0_49, %c0_50] : memref<2x1024xf32, #tpu.memory_space<vmem>>, vector<2x1024xf32>
    tpu.vector_store %arg6[%c0_49, %c0_50], %152 {strides = array<i32>} : memref<2x1024xf32, #tpu.memory_space<vmem>>, vector<2x1024xf32>,
    %c0_51 = arith.constant 0 : index
    %c0_52 = arith.constant 0 : index
    %154 = vector.load %arg7[%c0_51, %c0_52] : memref<2x1024xf32, #tpu.memory_space<vmem>>, vector<2x1024xf32>
    tpu.vector_store %arg7[%c0_51, %c0_52], %142 {strides = array<i32>} : memref<2x1024xf32, #tpu.memory_space<vmem>>, vector<2x1024xf32>,
    return
  }
  func.func @transform_0(%arg0: i32, %arg1: i32, %arg2: i32) -> i32 {
    %c0_i32 = arith.constant 0 : i32
    %c0_i32_0 = arith.constant 0 : i32
    return %c0_i32 : i32
  }
  func.func @transform_1(%arg0: i32, %arg1: i32, %arg2: i32) -> (i32, i32, i32) {
    %c0_i32 = arith.constant 0 : i32
    return %arg0, %arg2, %arg1 : i32, i32, i32
  }
  func.func @transform_2(%arg0: i32, %arg1: i32, %arg2: i32) -> (i32, i32, i32) {
    %c0_i32 = arith.constant 0 : i32
    return %arg0, %arg2, %arg1 : i32, i32, i32
  }
}

</mosaic_0001>

<bundles_post_ra>
// kernel: tpu_custom_call.1
= control target key start
LH: loop header
LB: loop body
LE: loop exit
PB: predicated region body
PF: predicated region fallthrough
CT: control target
= control target key end

     0   :  { %7 = vsyncpa [#allocation7], 0  ;;  %s1069_s0 = inlined_call_operand.hbm [shape: f32[4], index: 0, kind: input, shape index: {}]   ;;  %s1070_s1 = inlined_call_operand.hbm [shape: f32[2,8,1024], index: 1, kind: input, shape index: {}]   ;;  %s1071_s2 = inlined_call_operand.hbm [shape: f32[2,8,1024], index: 2, kind: output, shape index: {}]  }
   0x1   :  { %8 = vsyncpa [#allocation5], 0 }
   0x2   :  { %9 = vsyncpa [#allocation6], 0  ;;  %s894_s9 = smov [#allocation4]   ;;  %s895_s12 = smov [#allocation8]  }
   0x3   :  { %17 = dma.hbm_to_smem %s1069_s0, 16, %s894_s9, [#allocation7]  }
   0x4   :  { %s23_s13 = sshll.u32 %s895_s12, 4  ;;  %s24_s13 = int_to_ptr.vmem [resolvable:$true] %s23_s13 }
   0x5   :  { %s856_s14 = scalar_lea.vmem %s24_s13, 2048  ;;  %p861_p1 = scmp.lt.s32.totalorder %s24_s13, %s24_s13 }
   0x6   :  { %p857_p0 = scmp.ne.s32.totalorder %s24_s13, %s856_s14  ;;  %p862_p2 = scmp.lt.s32.totalorder %s856_s14, %s856_s14 }
   0x8   :  { %p863_p3 = por %p862_p2, %p861_p1 }
   0xa   :  { %p864_p4 = pnand %p863_p3, %p857_p0 }
   0xc   :  { %867 = shalt.err (!%p864_p4)
}
   0xd   :  { %s896_s15 = smov 1024   ;;  %s897_s16 = smov 64  }
   0xe   :  { %29 = dma.hbm_to_vmem [thread:$0]  %s1070_s1, 2048, %s24_s13, [#allocation5], %s896_s15, %s896_s15, %s897_s16  }
   0xf   :  { %888 = dma.done.wait [#allocation7], 16  }
  0x10   :  { %889 = vsyncadd [#allocation7], 4294967280 }
  0x11   :  { %890 = dma.done.wait [#allocation5], 2048  }
  0x12   :  { %891 = vsyncadd [#allocation5], 4294965248 }
  0x13   :  { %36 = sfence }
  0x14   :  { %v68_v0 = vlaneseq  ;;  %s37_s0 = sld [smem:[#allocation4]]  ;;  %v898_v1 = vmov 1966171168   ;;  %v53_v4 = vld [vmem:[#allocation8] ss:$8 sm:$0xf] }
  0x15   :  { %v66_v2 = vunpack.c.l.s4 %v898_v1  ;;  %s814_s19 = sld [smem:[#allocation4 + $0x2]]  ;;  %v54_v5 = vld [vmem:[#allocation8] ss:$8 sm:$0xf0]  ;;  %v899_v10 = vmov 1935823168  }
  0x16   :  { %v69_v3 = vshrl.u32 %v68_v0, 7  ;;  %v57_v7 = vld [vmem:[#allocation8 + $0x40] ss:$8 sm:$0xf]  ;;  %v93_v11 = vunpack.c.l.s4 %v899_v10  ;;  %v55_v12 = vor.u32 %v54_v5, %v53_v4  ;;  %v900_v14 = vmov 0.0   ;;  %s813_s1 = sld [smem:[#allocation4 + $0x1]] }
  0x17   :  { %v67_v6 = vunpack.c.0.s8 %v66_v2  ;;  %v58_v8 = vld [vmem:[#allocation8 + $0x40] ss:$8 sm:$0xf0]  ;;  %s815_s20 = sld [smem:[#allocation4 + $0x3]]  ;;  %s901_s21 = smov [#allocation9]  }
  0x18   :  { %v59_v13 = vor.u32 %v58_v8, %v57_v7  ;;  %v94_v18 = vunpack.c.0.s8 %v93_v11  ;;  %v148_v31 = vld [vmem:[#allocation8 + $0x1] ss:$8 sm:$0xf]  ;;  %v240_v1 = vld [vmem:[#allocation8 + $0x2] ss:$8 sm:$0xf] }
  0x19   :  { %v926_v9 = vsub.s32 %v67_v6, %v69_v3  ;;  %v149_v32 = vld [vmem:[#allocation8 + $0x1] ss:$8 sm:$0xf0]  ;;  %v241_v2 = vld [vmem:[#allocation8 + $0x2] ss:$8 sm:$0xf0] }
  0x1a   :  { %v930_v19 = vstv %s37_s0  ;;  %v936_v25 = vsub.s32 %v94_v18, %v69_v3  ;;  %v152_v34 = vld [vmem:[#allocation8 + $0x41] ss:$8 sm:$0xf]  ;;  %v150_v39 = vor.u32 %v149_v32, %v148_v31  ;;  %v244_v3 = vld [vmem:[#allocation8 + $0x42] ss:$8 sm:$0xf]  ;;  %v242_v7 = vor.u32 %v241_v2, %v240_v1 }
  0x1b   :  { %v71_v15 = vrot.slane %v900_v14, %v926_v9  ;;  %v932_v22 = vstv %s814_s19  ;;  %v153_v35 = vld [vmem:[#allocation8 + $0x41] ss:$8 sm:$0xf0]  ;;  %v245_v4 = vld [vmem:[#allocation8 + $0x42] ss:$8 sm:$0xf0] }
  0x1c   :  { %v61_v26 = vmul.f32 0.0, %v932_v22  ;;  %v941_v33 = vstv %s813_s1  ;;  %v154_v40 = vor.u32 %v153_v35, %v152_v34  ;;  %v246_v8 = vor.u32 %v245_v4, %v244_v3  ;;  %s800_s22 = sshll.u32 %s901_s21, 4  ;;  %s801_s22 = int_to_ptr.vmem [resolvable:$true] %s800_s22 }
  0x1d   :  { %v79_v16 = vcombine.low %v71_v15, %v71_v15  ;;  %v80_v17 = vcombine.high %v71_v15, %v71_v15  ;;  %v943_v38 = vstv %s815_s20  ;;  %s868_s23 = scalar_lea.vmem %s801_s22, 2048  ;;  %p873_p6 = scmp.lt.s32.totalorder %s801_s22, %s801_s22 }
  0x1e   :  { %p869_p5 = scmp.ne.s32.totalorder %s801_s22, %s868_s23  ;;  %p874_p7 = scmp.lt.s32.totalorder %s868_s23, %s868_s23 }
  0x1f   :  { %v83_v20 = vsub.f32 %v55_v12, %v79_v16  ;;  %v84_v21 = vsub.f32 %v59_v13, %v80_v17 }
  0x20   :  { %p875_p8 = por %p874_p7, %p873_p6 }
  0x21   :  { %v86_v23 = vmul.f32 %v930_v19, %v83_v20  ;;  %v87_v24 = vmul.f32 %v930_v19, %v84_v21 }
  0x22   :  { %p876_p9 = pnand %p875_p8, %p869_p5 }
  0x23   :  { %v90_v27 = vcombine.low %v86_v23, %v87_v24  ;;  %v91_v28 = vcombine.high %v86_v23, %v87_v24 }
  0x25   :  { %v98_v29 = vrot.slane %v90_v27, %v936_v25  ;;  %v105_v30 = vrot.slane %v91_v28, %v936_v25 }
  0x27   :  { %v108_v36 = vadd.f32 %v98_v29, %v61_v26  ;;  %v109_v37 = vadd.f32 %v105_v30, %v61_v26 }
  0x29   :  { %vm113_vm0 = vcmp.ge.f32.partialorder %v108_v36, %v941_v33  ;;  %vm114_vm1 = vcmp.ge.f32.partialorder %v109_v37, %v941_v33  ;;  %v155_v57 = vmul.f32 %v108_v36, %v932_v22  ;;  %v156_v58 = vmul.f32 %v109_v37, %v932_v22 }
  0x2a   :  { %v816_v41 = vsel %vm113_vm0, 1.0, %v900_v14  ;;  %v817_v42 = vsel %vm114_vm1, 1.0, %v900_v14  ;;  %v145_v43 = vsel %vm113_vm0, %v943_v38, %v108_v36  ;;  %v146_v44 = vsel %vm114_vm1, %v943_v38, %v109_v37 }
  0x2b   :  { %v127_v45 = vrot.slane %v816_v41, %v926_v9  ;;  %v134_v46 = vrot.slane %v817_v42, %v926_v9  ;;  %v165_v47 = vrot.slane %v145_v43, %v926_v9  ;;  %v172_v48 = vrot.slane %v146_v44, %v926_v9  ;;  %v333_v41 = vld [vmem:[#allocation8 + $0x3] ss:$8 sm:$0xf0] }
  0x2c   :  { %v336_v42 = vld [vmem:[#allocation8 + $0x43] ss:$8 sm:$0xf] }
  0x2d   :  { %v135_v49 = vcombine.low %v127_v45, %v134_v46  ;;  %v173_v50 = vcombine.low %v165_v47, %v172_v48  ;;  %v174_v51 = vcombine.high %v165_v47, %v172_v48  ;;  %v136_v52 = vcombine.high %v127_v45, %v134_v46 }
  0x2f   :  { %139 = vst [vmem:[#allocation9] ss:$8 sm:$0xf] %v135_v49  ;;  %v177_v53 = vsub.f32 %v150_v39, %v173_v50  ;;  %v178_v54 = vsub.f32 %v154_v40, %v174_v51  ;;  %140 = vst [vmem:[#allocation9] ss:$8 sm:$0xf0] %v135_v49 }
  0x30   :  { %142 = vst [vmem:[#allocation9 + $0x40] ss:$8 sm:$0xf] %v136_v52  ;;  %143 = vst [vmem:[#allocation9 + $0x40] ss:$8 sm:$0xf0] %v136_v52 }
  0x31   :  { %v179_v55 = vmul.f32 %v177_v53, %v930_v19  ;;  %v180_v56 = vmul.f32 %v178_v54, %v930_v19  ;;  %v332_v40 = vld [vmem:[#allocation8 + $0x3] ss:$8 sm:$0xf] }
  0x32   :  { %v334_v46 = vor.u32 %v333_v41, %v332_v40 }
  0x33   :  { %v183_v59 = vcombine.low %v179_v55, %v180_v56  ;;  %v184_v60 = vcombine.high %v179_v55, %v180_v56 }
  0x35   :  { %v191_v61 = vrot.slane %v183_v59, %v936_v25  ;;  %v198_v62 = vrot.slane %v184_v60, %v936_v25 }
  0x37   :  { %v201_v63 = vadd.f32 %v191_v61, %v155_v57  ;;  %v202_v0 = vadd.f32 %v198_v62, %v156_v58 }
  0x39   :  { %v203_v5 = vadd.f32 %v201_v63, %v145_v43  ;;  %v204_v6 = vadd.f32 %v202_v0, %v146_v44  ;;  %v247_v30 = vmul.f32 %v201_v63, %v932_v22  ;;  %v248_v31 = vmul.f32 %v202_v0, %v932_v22  ;;  %v337_v43 = vld [vmem:[#allocation8 + $0x43] ss:$8 sm:$0xf0] }
  0x3a   :  { %v338_v47 = vor.u32 %v337_v43, %v336_v42 }
  0x3b   :  { %vm205_vm2 = vcmp.ge.f32.partialorder %v203_v5, %v941_v33  ;;  %vm206_vm3 = vcmp.ge.f32.partialorder %v204_v6, %v941_v33 }
  0x3c   :  { %v818_v10 = vsel %vm205_vm2, 1.0, %v900_v14  ;;  %v819_v11 = vsel %vm206_vm3, 1.0, %v900_v14  ;;  %v237_v12 = vsel %vm205_vm2, %v943_v38, %v203_v5  ;;  %v238_v13 = vsel %vm206_vm3, %v943_v38, %v204_v6 }
  0x3d   :  { %v219_v15 = vrot.slane %v818_v10, %v926_v9  ;;  %v226_v16 = vrot.slane %v819_v11, %v926_v9  ;;  %v257_v17 = vrot.slane %v237_v12, %v926_v9  ;;  %v264_v18 = vrot.slane %v238_v13, %v926_v9  ;;  %v425_v10 = vld [vmem:[#allocation8 + $0x4] ss:$8 sm:$0xf0] }
  0x3e   :  { %v428_v11 = vld [vmem:[#allocation8 + $0x44] ss:$8 sm:$0xf] }
  0x3f   :  { %v227_v20 = vcombine.low %v219_v15, %v226_v16  ;;  %v265_v21 = vcombine.low %v257_v17, %v264_v18  ;;  %v266_v23 = vcombine.high %v257_v17, %v264_v18  ;;  %v228_v24 = vcombine.high %v219_v15, %v226_v16 }
  0x41   :  { %232 = vst [vmem:[#allocation9 + $0x1] ss:$8 sm:$0xf] %v227_v20  ;;  %v269_v26 = vsub.f32 %v242_v7, %v265_v21  ;;  %v270_v27 = vsub.f32 %v246_v8, %v266_v23  ;;  %233 = vst [vmem:[#allocation9 + $0x1] ss:$8 sm:$0xf0] %v227_v20 }
  0x42   :  { %235 = vst [vmem:[#allocation9 + $0x41] ss:$8 sm:$0xf] %v228_v24  ;;  %236 = vst [vmem:[#allocation9 + $0x41] ss:$8 sm:$0xf0] %v228_v24 }
  0x43   :  { %v271_v28 = vmul.f32 %v269_v26, %v930_v19  ;;  %v272_v29 = vmul.f32 %v270_v27, %v930_v19  ;;  %v424_v8 = vld [vmem:[#allocation8 + $0x4] ss:$8 sm:$0xf] }
  0x44   :  { %v426_v16 = vor.u32 %v425_v10, %v424_v8 }
  0x45   :  { %v275_v32 = vcombine.low %v271_v28, %v272_v29  ;;  %v276_v34 = vcombine.high %v271_v28, %v272_v29 }
  0x47   :  { %v283_v35 = vrot.slane %v275_v32, %v936_v25  ;;  %v290_v36 = vrot.slane %v276_v34, %v936_v25 }
  0x49   :  { %v293_v37 = vadd.f32 %v283_v35, %v247_v30  ;;  %v294_v39 = vadd.f32 %v290_v36, %v248_v31 }
  0x4b   :  { %v295_v44 = vadd.f32 %v293_v37, %v237_v12  ;;  %v296_v45 = vadd.f32 %v294_v39, %v238_v13  ;;  %v339_v0 = vmul.f32 %v293_v37, %v932_v22  ;;  %v340_v1 = vmul.f32 %v294_v39, %v932_v22  ;;  %v429_v12 = vld [vmem:[#allocation8 + $0x44] ss:$8 sm:$0xf0] }
  0x4c   :  { %v430_v17 = vor.u32 %v429_v12, %v428_v11 }
  0x4d   :  { %vm297_vm4 = vcmp.ge.f32.partialorder %v295_v44, %v941_v33  ;;  %vm298_vm5 = vcmp.ge.f32.partialorder %v296_v45, %v941_v33 }
  0x4e   :  { %v820_v48 = vsel %vm297_vm4, 1.0, %v900_v14  ;;  %v821_v49 = vsel %vm298_vm5, 1.0, %v900_v14  ;;  %v329_v50 = vsel %vm297_vm4, %v943_v38, %v295_v44  ;;  %v330_v51 = vsel %vm298_vm5, %v943_v38, %v296_v45 }
  0x4f   :  { %v311_v52 = vrot.slane %v820_v48, %v926_v9  ;;  %v318_v53 = vrot.slane %v821_v49, %v926_v9  ;;  %v349_v54 = vrot.slane %v329_v50, %v926_v9  ;;  %v356_v55 = vrot.slane %v330_v51, %v926_v9  ;;  %v517_v48 = vld [vmem:[#allocation8 + $0x5] ss:$8 sm:$0xf0] }
  0x50   :  { %v520_v49 = vld [vmem:[#allocation8 + $0x45] ss:$8 sm:$0xf] }
  0x51   :  { %v319_v56 = vcombine.low %v311_v52, %v318_v53  ;;  %v357_v57 = vcombine.low %v349_v54, %v356_v55  ;;  %v358_v58 = vcombine.high %v349_v54, %v356_v55  ;;  %v320_v59 = vcombine.high %v311_v52, %v318_v53 }
  0x53   :  { %324 = vst [vmem:[#allocation9 + $0x2] ss:$8 sm:$0xf] %v319_v56  ;;  %v361_v60 = vsub.f32 %v334_v46, %v357_v57  ;;  %v362_v61 = vsub.f32 %v338_v47, %v358_v58  ;;  %325 = vst [vmem:[#allocation9 + $0x2] ss:$8 sm:$0xf0] %v319_v56 }
  0x54   :  { %327 = vst [vmem:[#allocation9 + $0x42] ss:$8 sm:$0xf] %v320_v59  ;;  %328 = vst [vmem:[#allocation9 + $0x42] ss:$8 sm:$0xf0] %v320_v59 }
  0x55   :  { %v363_v62 = vmul.f32 %v361_v60, %v930_v19  ;;  %v364_v63 = vmul.f32 %v362_v61, %v930_v19  ;;  %v516_v47 = vld [vmem:[#allocation8 + $0x5] ss:$8 sm:$0xf] }
  0x56   :  { %v518_v53 = vor.u32 %v517_v48, %v516_v47 }
  0x57   :  { %v367_v2 = vcombine.low %v363_v62, %v364_v63  ;;  %v368_v3 = vcombine.high %v363_v62, %v364_v63 }
  0x59   :  { %v375_v4 = vrot.slane %v367_v2, %v936_v25  ;;  %v382_v5 = vrot.slane %v368_v3, %v936_v25 }
  0x5b   :  { %v385_v6 = vadd.f32 %v375_v4, %v339_v0  ;;  %v386_v7 = vadd.f32 %v382_v5, %v340_v1 }
  0x5d   :  { %v387_v13 = vadd.f32 %v385_v6, %v329_v50  ;;  %v388_v15 = vadd.f32 %v386_v7, %v330_v51  ;;  %v431_v39 = vmul.f32 %v385_v6, %v932_v22  ;;  %v432_v40 = vmul.f32 %v386_v7, %v932_v22  ;;  %v521_v50 = vld [vmem:[#allocation8 + $0x45] ss:$8 sm:$0xf0] }
  0x5e   :  { %v522_v54 = vor.u32 %v521_v50, %v520_v49 }
  0x5f   :  { %vm389_vm6 = vcmp.ge.f32.partialorder %v387_v13, %v941_v33  ;;  %vm390_vm7 = vcmp.ge.f32.partialorder %v388_v15, %v941_v33 }
  0x60   :  { %v822_v18 = vsel %vm389_vm6, 1.0, %v900_v14  ;;  %v823_v20 = vsel %vm390_vm7, 1.0, %v900_v14  ;;  %v421_v21 = vsel %vm389_vm6, %v943_v38, %v387_v13  ;;  %v422_v23 = vsel %vm390_vm7, %v943_v38, %v388_v15 }
  0x61   :  { %v403_v24 = vrot.slane %v822_v18, %v926_v9  ;;  %v410_v26 = vrot.slane %v823_v20, %v926_v9  ;;  %v441_v27 = vrot.slane %v421_v21, %v926_v9  ;;  %v448_v28 = vrot.slane %v422_v23, %v926_v9  ;;  %v609_v18 = vld [vmem:[#allocation8 + $0x6] ss:$8 sm:$0xf0] }
  0x62   :  { %v612_v20 = vld [vmem:[#allocation8 + $0x46] ss:$8 sm:$0xf] }
  0x63   :  { %v411_v29 = vcombine.low %v403_v24, %v410_v26  ;;  %v449_v30 = vcombine.low %v441_v27, %v448_v28  ;;  %v450_v31 = vcombine.high %v441_v27, %v448_v28  ;;  %v412_v32 = vcombine.high %v403_v24, %v410_v26 }
  0x65   :  { %416 = vst [vmem:[#allocation9 + $0x3] ss:$8 sm:$0xf] %v411_v29  ;;  %v453_v34 = vsub.f32 %v426_v16, %v449_v30  ;;  %v454_v35 = vsub.f32 %v430_v17, %v450_v31  ;;  %417 = vst [vmem:[#allocation9 + $0x3] ss:$8 sm:$0xf0] %v411_v29 }
  0x66   :  { %419 = vst [vmem:[#allocation9 + $0x43] ss:$8 sm:$0xf] %v412_v32  ;;  %420 = vst [vmem:[#allocation9 + $0x43] ss:$8 sm:$0xf0] %v412_v32 }
  0x67   :  { %v455_v36 = vmul.f32 %v453_v34, %v930_v19  ;;  %v456_v37 = vmul.f32 %v454_v35, %v930_v19  ;;  %v608_v17 = vld [vmem:[#allocation8 + $0x6] ss:$8 sm:$0xf] }
  0x68   :  { %v610_v26 = vor.u32 %v609_v18, %v608_v17 }
  0x69   :  { %v459_v41 = vcombine.low %v455_v36, %v456_v37  ;;  %v460_v42 = vcombine.high %v455_v36, %v456_v37 }
  0x6b   :  { %v467_v43 = vrot.slane %v459_v41, %v936_v25  ;;  %v474_v44 = vrot.slane %v460_v42, %v936_v25 }
  0x6d   :  { %v477_v45 = vadd.f32 %v467_v43, %v431_v39  ;;  %v478_v46 = vadd.f32 %v474_v44, %v432_v40 }
  0x6f   :  { %v479_v51 = vadd.f32 %v477_v45, %v421_v21  ;;  %v480_v52 = vadd.f32 %v478_v46, %v422_v23  ;;  %v523_v7 = vmul.f32 %v477_v45, %v932_v22  ;;  %v524_v8 = vmul.f32 %v478_v46, %v932_v22  ;;  %v613_v21 = vld [vmem:[#allocation8 + $0x46] ss:$8 sm:$0xf0] }
  0x70   :  { %v614_v27 = vor.u32 %v613_v21, %v612_v20 }
  0x71   :  { %vm481_vm8 = vcmp.ge.f32.partialorder %v479_v51, %v941_v33  ;;  %vm482_vm9 = vcmp.ge.f32.partialorder %v480_v52, %v941_v33 }
  0x72   :  { %v824_v55 = vsel %vm481_vm8, 1.0, %v900_v14  ;;  %v825_v56 = vsel %vm482_vm9, 1.0, %v900_v14  ;;  %v513_v57 = vsel %vm481_vm8, %v943_v38, %v479_v51  ;;  %v514_v58 = vsel %vm482_vm9, %v943_v38, %v480_v52 }
  0x73   :  { %v495_v59 = vrot.slane %v824_v55, %v926_v9  ;;  %v502_v60 = vrot.slane %v825_v56, %v926_v9  ;;  %v533_v61 = vrot.slane %v513_v57, %v926_v9  ;;  %v540_v62 = vrot.slane %v514_v58, %v926_v9  ;;  %v701_v55 = vld [vmem:[#allocation8 + $0x7] ss:$8 sm:$0xf0] }
  0x74   :  { %v704_v56 = vld [vmem:[#allocation8 + $0x47] ss:$8 sm:$0xf] }
  0x75   :  { %v503_v63 = vcombine.low %v495_v59, %v502_v60  ;;  %v541_v0 = vcombine.low %v533_v61, %v540_v62  ;;  %v542_v1 = vcombine.high %v533_v61, %v540_v62  ;;  %v504_v2 = vcombine.high %v495_v59, %v502_v60 }
  0x77   :  { %508 = vst [vmem:[#allocation9 + $0x4] ss:$8 sm:$0xf] %v503_v63  ;;  %v545_v3 = vsub.f32 %v518_v53, %v541_v0  ;;  %v546_v4 = vsub.f32 %v522_v54, %v542_v1  ;;  %509 = vst [vmem:[#allocation9 + $0x4] ss:$8 sm:$0xf0] %v503_v63 }
  0x78   :  { %511 = vst [vmem:[#allocation9 + $0x44] ss:$8 sm:$0xf] %v504_v2  ;;  %512 = vst [vmem:[#allocation9 + $0x44] ss:$8 sm:$0xf0] %v504_v2 }
  0x79   :  { %v547_v5 = vmul.f32 %v545_v3, %v930_v19  ;;  %v548_v6 = vmul.f32 %v546_v4, %v930_v19  ;;  %v700_v54 = vld [vmem:[#allocation8 + $0x7] ss:$8 sm:$0xf] }
  0x7a   :  { %v702_v60 = vor.u32 %v701_v55, %v700_v54 }
  0x7b   :  { %v551_v10 = vcombine.low %v547_v5, %v548_v6  ;;  %v552_v11 = vcombine.high %v547_v5, %v548_v6 }
  0x7d   :  { %v559_v12 = vrot.slane %v551_v10, %v936_v25  ;;  %v566_v13 = vrot.slane %v552_v11, %v936_v25 }
  0x7f   :  { %v569_v15 = vadd.f32 %v559_v12, %v523_v7  ;;  %v570_v16 = vadd.f32 %v566_v13, %v524_v8 }
  0x81   :  { %v571_v23 = vadd.f32 %v569_v15, %v513_v57  ;;  %v572_v24 = vadd.f32 %v570_v16, %v514_v58  ;;  %v615_v46 = vmul.f32 %v569_v15, %v932_v22  ;;  %v616_v47 = vmul.f32 %v570_v16, %v932_v22  ;;  %v705_v57 = vld [vmem:[#allocation8 + $0x47] ss:$8 sm:$0xf0] }
  0x82   :  { %v706_v61 = vor.u32 %v705_v57, %v704_v56 }
  0x83   :  { %vm573_vm10 = vcmp.ge.f32.partialorder %v571_v23, %v941_v33  ;;  %vm574_vm11 = vcmp.ge.f32.partialorder %v572_v24, %v941_v33 }
  0x84   :  { %v826_v28 = vsel %vm573_vm10, 1.0, %v900_v14  ;;  %v827_v29 = vsel %vm574_vm11, 1.0, %v900_v14  ;;  %v605_v30 = vsel %vm573_vm10, %v943_v38, %v571_v23  ;;  %v606_v31 = vsel %vm574_vm11, %v943_v38, %v572_v24 }
  0x85   :  { %v587_v32 = vrot.slane %v826_v28, %v926_v9  ;;  %v594_v34 = vrot.slane %v827_v29, %v926_v9  ;;  %v625_v35 = vrot.slane %v605_v30, %v926_v9  ;;  %v632_v36 = vrot.slane %v606_v31, %v926_v9 }
  0x87   :  { %v595_v37 = vcombine.low %v587_v32, %v594_v34  ;;  %v633_v39 = vcombine.low %v625_v35, %v632_v36  ;;  %v634_v40 = vcombine.high %v625_v35, %v632_v36  ;;  %v596_v41 = vcombine.high %v587_v32, %v594_v34 }
  0x89   :  { %600 = vst [vmem:[#allocation9 + $0x5] ss:$8 sm:$0xf] %v595_v37  ;;  %v637_v42 = vsub.f32 %v610_v26, %v633_v39  ;;  %v638_v43 = vsub.f32 %v614_v27, %v634_v40  ;;  %601 = vst [vmem:[#allocation9 + $0x5] ss:$8 sm:$0xf0] %v595_v37 }
  0x8a   :  { %603 = vst [vmem:[#allocation9 + $0x45] ss:$8 sm:$0xf] %v596_v41  ;;  %604 = vst [vmem:[#allocation9 + $0x45] ss:$8 sm:$0xf0] %v596_v41 }
  0x8b   :  { %v639_v44 = vmul.f32 %v637_v42, %v930_v19  ;;  %v640_v45 = vmul.f32 %v638_v43, %v930_v19 }
  0x8d   :  { %v643_v48 = vcombine.low %v639_v44, %v640_v45  ;;  %v644_v49 = vcombine.high %v639_v44, %v640_v45 }
  0x8f   :  { %v651_v50 = vrot.slane %v643_v48, %v936_v25  ;;  %v658_v51 = vrot.slane %v644_v49, %v936_v25 }
  0x91   :  { %v661_v52 = vadd.f32 %v651_v50, %v615_v46  ;;  %v662_v53 = vadd.f32 %v658_v51, %v616_v47 }
  0x93   :  { %v663_v58 = vadd.f32 %v661_v52, %v605_v30  ;;  %v664_v59 = vadd.f32 %v662_v53, %v606_v31  ;;  %v707_v15 = vmul.f32 %v661_v52, %v932_v22  ;;  %v708_v16 = vmul.f32 %v662_v53, %v932_v22 }
  0x95   :  { %vm665_vm12 = vcmp.ge.f32.partialorder %v663_v58, %v941_v33  ;;  %vm666_vm13 = vcmp.ge.f32.partialorder %v664_v59, %v941_v33 }
  0x96   :  { %v828_v62 = vsel %vm665_vm12, 1.0, %v900_v14  ;;  %v829_v63 = vsel %vm666_vm13, 1.0, %v900_v14  ;;  %v697_v0 = vsel %vm665_vm12, %v943_v38, %v663_v58  ;;  %v698_v1 = vsel %vm666_vm13, %v943_v38, %v664_v59 }
  0x97   :  { %v679_v2 = vrot.slane %v828_v62, %v926_v9  ;;  %v686_v3 = vrot.slane %v829_v63, %v926_v9  ;;  %v717_v4 = vrot.slane %v697_v0, %v926_v9  ;;  %v724_v5 = vrot.slane %v698_v1, %v926_v9 }
  0x99   :  { %v687_v6 = vcombine.low %v679_v2, %v686_v3  ;;  %v725_v7 = vcombine.low %v717_v4, %v724_v5  ;;  %v726_v8 = vcombine.high %v717_v4, %v724_v5  ;;  %v688_v10 = vcombine.high %v679_v2, %v686_v3 }
  0x9b   :  { %692 = vst [vmem:[#allocation9 + $0x6] ss:$8 sm:$0xf] %v687_v6  ;;  %v729_v11 = vsub.f32 %v702_v60, %v725_v7  ;;  %v730_v12 = vsub.f32 %v706_v61, %v726_v8  ;;  %693 = vst [vmem:[#allocation9 + $0x6] ss:$8 sm:$0xf0] %v687_v6 }
  0x9c   :  { %695 = vst [vmem:[#allocation9 + $0x46] ss:$8 sm:$0xf] %v688_v10  ;;  %696 = vst [vmem:[#allocation9 + $0x46] ss:$8 sm:$0xf0] %v688_v10 }
  0x9d   :  { %v731_v38 = vmul.f32 %v729_v11, %v930_v19  ;;  %v732_v13 = vmul.f32 %v730_v12, %v930_v19 }
  0x9f   :  { %v735_v17 = vcombine.low %v731_v38, %v732_v13  ;;  %v736_v18 = vcombine.high %v731_v38, %v732_v13 }
  0xa1   :  { %v743_v20 = vrot.slane %v735_v17, %v936_v25  ;;  %v750_v21 = vrot.slane %v736_v18, %v936_v25 }
  0xa3   :  { %v753_v23 = vadd.f32 %v743_v20, %v707_v15  ;;  %v754_v24 = vadd.f32 %v750_v21, %v708_v16 }
  0xa5   :  { %v755_v26 = vadd.f32 %v753_v23, %v697_v0  ;;  %v756_v27 = vadd.f32 %v754_v24, %v698_v1 }
  0xa7   :  { %vm757_vm14 = vcmp.ge.f32.partialorder %v755_v26, %v941_v33  ;;  %vm758_vm15 = vcmp.ge.f32.partialorder %v756_v27, %v941_v33 }
  0xa8   :  { %v830_v19 = vsel %vm757_vm14, 1.0, %v900_v14  ;;  %v831_v28 = vsel %vm758_vm15, 1.0, %v900_v14 }
  0xa9   :  { %v771_v22 = vrot.slane %v830_v19, %v926_v9  ;;  %v778_v29 = vrot.slane %v831_v28, %v926_v9 }
  0xab   :  { %v779_v30 = vcombine.low %v771_v22, %v778_v29  ;;  %v780_v25 = vcombine.high %v771_v22, %v778_v29 }
  0xad   :  { %784 = vst [vmem:[#allocation9 + $0x7] ss:$8 sm:$0xf] %v779_v30  ;;  %785 = vst [vmem:[#allocation9 + $0x7] ss:$8 sm:$0xf0] %v779_v30 }
  0xae   :  { %787 = vst [vmem:[#allocation9 + $0x47] ss:$8 sm:$0xf] %v780_v25  ;;  %788 = vst [vmem:[#allocation9 + $0x47] ss:$8 sm:$0xf0] %v780_v25 }
  0xaf   :  { %879 = shalt.err (!%p876_p9)
}
  0xb0   :  { %806 = dma.vmem_to_hbm [thread:$0]  %s801_s22, 2048, %s1071_s2, [#allocation6], %s896_s15, %s896_s15, %s897_s16  }
  0xb1   :  { %892 = dma.done.wait [#allocation6], 2048  }
  0xb2   :  { %893 = vsyncadd [#allocation6], 4294965248 }
  0xb3   :  { %810 = vsyncpa [#allocation5], 1 }
  0xb4   :  { %811 = vsyncpa [#allocation6], 1 }
  0xb5   :  { %812 = vsyncpa [#allocation7], 1 }

</bundles_post_ra>
